<compile_context>
chip_gen: v7x
topology: tpu7x:2x2x1
jax: 0.10.0
libtpu: 0.0.40
codegen_flags: <defaults>
</compile_context>

<pallas_src>
from abc import ABCMeta, abstractmethod

import jax
import jax.numpy as jnp
from jax.experimental import pallas as pl
from jax.experimental.pallas import tpu as pltpu


# ----------------------------------------------------------------------------
# Pallas kernel: fused 1x1 conv (channel contraction) + bias + ReLU,
# channel-major layout.
# ----------------------------------------------------------------------------
def _conv1x1_relu_kernel(x_ref, w_ref, b_ref, o_ref):
    # x_ref: (1, C_in, TP)   activations, bf16 (lane dim = pixels)
    # w_ref: (C_out, C_in)   weights, bf16     (resident: constant index_map)
    # b_ref: (C_out, 1)      bias, f32         (resident: constant index_map)
    # o_ref: (1, C_out, TP)  output, bf16      (lane dim = pixels)
    c_in = x_ref.shape[1]
    x = x_ref[0].astype(jnp.float32)          # upcast: f32 VPU path (v5e-safe)
    w = w_ref[...].astype(jnp.float32)
    # C_in-term broadcast-FMA on the VPU: out[o, p] = sum_k w[o, k] * x[k, p].
    acc = w[:, 0:1] * x[0:1, :]               # (C_out,1)*(1,TP) -> (C_out,TP)
    for k in range(1, c_in):                  # static, tiny (C_in=4) -> unrolled
        acc = acc + w[:, k:k + 1] * x[k:k + 1, :]
    y = acc + b_ref[...]                      # bias broadcast across lanes
    o_ref[0] = jnp.maximum(y, 0.0).astype(o_ref.dtype)


def _round_up(v, m):
    return -(-v // m) * m


def conv1x1_relu(x, w, b, *, tile_p=4096):
    """Channel-major fused 1x1 conv + bias + ReLU.

    x: (N, C_in, P)   activations (bf16 preferred), P = H*W pixels
    w: (C_out, C_in)  weights
    b: (C_out,)       bias (f32)
    returns (N, C_out, P) in x.dtype
    """
    N, C_in, P = x.shape
    C_out = w.shape[0]

    # Lane-dense pixel tiling: tile is a multiple of 128; clamp to the
    # (128-rounded) pixel count so small images use a single block.
    tp = min(_round_up(tile_p, 128), _round_up(P, 128))
    P_pad = _round_up(P, tp)
    if P_pad != P:
        # Tail handling: pad pixels up to a whole tile (no-op when aligned).
        x = jnp.pad(x, ((0, 0), (0, 0), (0, P_pad - P)))

    b2 = b.reshape(C_out, 1).astype(jnp.float32)

    out = pl.pallas_call(
        _conv1x1_relu_kernel,
        out_shape=jax.ShapeDtypeStruct((N, C_out, P_pad), x.dtype),
        grid_spec=pltpu.PrefetchScalarGridSpec(
            num_scalar_prefetch=0,
            grid=(N, P_pad // tp),
            in_specs=[
                pl.BlockSpec((1, C_in, tp), lambda n, i: (n, 0, i)),
                pl.BlockSpec((C_out, C_in), lambda n, i: (0, 0)),  # resident
                pl.BlockSpec((C_out, 1), lambda n, i: (0, 0)),     # resident
            ],
            out_specs=pl.BlockSpec((1, C_out, tp), lambda n, i: (n, 0, i)),
        ),
        compiler_params=pltpu.CompilerParams(
            dimension_semantics=("parallel", "parallel")),
    )(x, w, b2)

    if P_pad != P:
        out = out[:, :, :P]
    return out


# ----------------------------------------------------------------------------
# BaseDetector port (dispatch semantics) + minimal concrete detector
# ----------------------------------------------------------------------------
class BaseDetector(metaclass=ABCMeta):
    """Base class for detectors (JAX port of mmdet BaseDetector dispatch)."""

    def __init__(self):
        self.fp16_enabled = False

    @property
    def with_neck(self):
        return hasattr(self, "neck") and self.neck is not None

    @property
    def with_shared_head(self):
        return hasattr(self, "shared_head") and self.shared_head is not None

    @property
    def with_bbox(self):
        return hasattr(self, "bbox_head") and self.bbox_head is not None

    @property
    def with_mask(self):
        return hasattr(self, "mask_head") and self.mask_head is not None

    @abstractmethod
    def extract_feat(self, imgs):
        pass

    def extract_feats(self, imgs):
        assert isinstance(imgs, list)
        for img in imgs:
            yield self.extract_feat(img)

    @abstractmethod
    def forward_train(self, imgs, img_metas, **kwargs):
        pass

    @abstractmethod
    def simple_test(self, img, img_meta, **kwargs):
        pass

    @abstractmethod
    def aug_test(self, imgs, img_metas, **kwargs):
        pass

    def init_weights(self, pretrained=None):
        # TODO(synk): no checkpoint loading in the synthetic kernel version.
        pass

    def forward_test(self, imgs, img_metas, **kwargs):
        for var, name in [(imgs, "imgs"), (img_metas, "img_metas")]:
            if not isinstance(var, list):
                raise TypeError("{} must be a list, but got {}".format(name, type(var)))
        num_augs = len(imgs)
        if num_augs != len(img_metas):
            raise ValueError(
                "num of augmentations ({}) != num of image meta ({})".format(
                    len(imgs), len(img_metas)))
        imgs_per_gpu = imgs[0].shape[0]
        assert imgs_per_gpu == 1
        if num_augs == 1:
            return self.simple_test(imgs[0], img_metas[0], **kwargs)
        else:
            return self.aug_test(imgs, img_metas, **kwargs)

    def forward(self, img, img_meta, return_loss=True, **kwargs):
        if return_loss:
            return self.forward_train(img, img_meta, **kwargs)
        else:
            return self.forward_test(img, img_meta, **kwargs)

    # show_result omitted: pure visualization (mmcv / pycocotools), no tensor compute.


class SimplePallasDetector(BaseDetector):
    """Minimal concrete detector whose extract_feat runs the Pallas kernel."""

    def __init__(self, in_channels=4, feat_channels=32, tile_p=4096,
                 compute_dtype=jnp.bfloat16):
        super().__init__()
        self.in_channels = in_channels
        self.feat_channels = feat_channels
        self.tile_p = tile_p
        self.compute_dtype = compute_dtype
        # Deterministic parameter init (no checkpoint): 1x1 conv weight + bias.
        # Weight stored (C_out, C_in) in bf16 (half-width HBM residency);
        # bias stays f32 (tiny, added post-accumulate inside the kernel).
        kw, kb = jax.random.split(jax.random.PRNGKey(42))
        scale = 1.0 / jnp.sqrt(jnp.float32(in_channels))
        self.conv_w = (jax.random.normal(
            kw, (feat_channels, in_channels), jnp.float32) * scale
        ).astype(compute_dtype)
        self.conv_b = jax.random.normal(kb, (feat_channels,), jnp.float32) * 0.01

    def extract_feat(self, img):
        # img: (N, C, H, W) (PyTorch NCHW).  Channel-major view (N, C, H*W) is
        # a free reshape -- no NCHW<->NHWC transposes around the kernel.
        N, C, H, W = img.shape
        x = img.astype(self.compute_dtype).reshape(N, C, H * W)
        y = conv1x1_relu(x, self.conv_w, self.conv_b, tile_p=self.tile_p)
        return y.reshape(N, self.feat_channels, H, W)   # NCHW out, free reshape

    def forward_train(self, imgs, img_metas, **kwargs):
        feat = self.extract_feat(imgs)
        # Dummy scalar loss over the extracted features.
        return {"loss_feat": jnp.mean(feat.astype(jnp.float32))}

    def simple_test(self, img, img_meta, **kwargs):
        return self.extract_feat(img)

    def aug_test(self, imgs, img_metas, **kwargs):
        feats = [self.extract_feat(img).astype(jnp.float32) for img in imgs]
        return jnp.mean(jnp.stack(feats, axis=0), axis=0)


# ----------------------------------------------------------------------------
# main
# ----------------------------------------------------------------------------
if __name__ == "__main__":
    key = jax.random.PRNGKey(0)
    k_train, k_test = jax.random.split(key)
    N, C, H, W = 2, 4, 16, 16
    C_OUT = 32

    detector = SimplePallasDetector(in_channels=C, feat_channels=C_OUT)
    detector.init_weights()

    # Activations live in bf16 in HBM (halves traffic; kernel accumulates f32).
    img_train = jax.random.normal(k_train, (N, C, H, W), jnp.float32).astype(jnp.bfloat16)
    img_test = jax.random.normal(k_test, (1, C, H, W), jnp.float32).astype(jnp.bfloat16)

    metas_train = [dict(img_shape=(H, W, C), scale_factor=1.0, flip=False)
                   for _ in range(N)]
    meta_test = [dict(img_shape=(H, W, C), scale_factor=1.0, flip=False)]

    # Train path: return_loss=True, img / img_metas passed directly (batch=2).
    losses = detector.forward(img_train, metas_train, return_loss=True)
    jax.block_until_ready(losses["loss_feat"])

    # Test path: return_loss=False, single-aug list-nested inputs, batch of 1.
    feat = detector.forward([img_test], [meta_test], return_loss=False)
    feat = jax.block_until_ready(feat)
    assert feat.shape == (1, C_OUT, H, W)

    # Reference check against plain-JAX 1x1 conv on the same bf16-rounded data.
    def ref_feat(img):
        n, c, h, w = img.shape
        xr = img.astype(jnp.float32).reshape(n, c, h * w)
        wr = detector.conv_w.astype(jnp.float32)
        br = detector.conv_b.reshape(1, C_OUT, 1)
        yr = jnp.maximum(
            jnp.einsum("oc,ncp->nop", wr, xr,
                       preferred_element_type=jnp.float32) + br, 0.0)
        return yr.reshape(n, C_OUT, h, w)

    ref_test = ref_feat(img_test)
    assert jnp.allclose(feat.astype(jnp.float32), ref_test,
                        atol=2e-2, rtol=2e-2), "test-path mismatch"

    feat_train = jax.block_until_ready(detector.extract_feat(img_train))
    ref_train = ref_feat(img_train)
    assert jnp.allclose(feat_train.astype(jnp.float32), ref_train,
                        atol=2e-2, rtol=2e-2), "train-path mismatch"

    print("KERNEL_OK")
</pallas_src>

<mosaic_0001>
module attributes {stable_mosaic.version = 11 : i64} {
  func.func @_conv1x1_relu_kernel(%arg0: i32, %arg1: i32, %arg2: memref<1x4x256xbf16, #tpu.memory_space<vmem>>, %arg3: memref<32x4xbf16, #tpu.memory_space<vmem>>, %arg4: memref<32x1xf32, #tpu.memory_space<vmem>>, %arg5: memref<1x32x256xbf16, #tpu.memory_space<vmem>>) attributes {dimension_semantics = [#tpu.dimension_semantics<parallel>, #tpu.dimension_semantics<parallel>], iteration_bounds = array<i64: 2, 1>, scalar_prefetch = 0 : i64, scratch_operands = 0 : i64, tpu.core_type = #tpu.core_type<tc>, window_params = [{transform_indices = @transform_0, window_bounds = array<i64: 1, 4, 256>}, {pipeline_mode = #tpu.pipeline_mode<synchronous>, transform_indices = @transform_1, window_bounds = array<i64: 32, 4>}, {pipeline_mode = #tpu.pipeline_mode<synchronous>, transform_indices = @transform_2, window_bounds = array<i64: 32, 1>}, {transform_indices = @transform_3, window_bounds = array<i64: 1, 32, 256>}]} {
    %c0 = arith.constant 0 : index
    %c0_0 = arith.constant 0 : index
    %c0_1 = arith.constant 0 : index
    %0 = vector.load %arg2[%c0, %c0_0, %c0_1] : memref<1x4x256xbf16, #tpu.memory_space<vmem>>, vector<1x4x256xbf16>
    %1 = vector.shape_cast %0 : vector<1x4x256xbf16> to vector<4x256xbf16>
    %2 = arith.extf %1 : vector<4x256xbf16> to vector<4x256xf32>
    %c0_2 = arith.constant 0 : index
    %c0_3 = arith.constant 0 : index
    %3 = vector.load %arg3[%c0_2, %c0_3] : memref<32x4xbf16, #tpu.memory_space<vmem>>, vector<32x4xbf16>
    %4 = arith.extf %3 : vector<32x4xbf16> to vector<32x4xf32>
    %5 = vector.extract_strided_slice %4 {offsets = [0, 0], sizes = [32, 1], strides = [1, 1]} : vector<32x4xf32> to vector<32x1xf32>
    %6 = vector.extract_strided_slice %2 {offsets = [0, 0], sizes = [1, 256], strides = [1, 1]} : vector<4x256xf32> to vector<1x256xf32>
    %7 = vector.broadcast %5 : vector<32x1xf32> to vector<32x256xf32>
    %8 = vector.broadcast %6 : vector<1x256xf32> to vector<32x256xf32>
    %9 = arith.mulf %7, %8 : vector<32x256xf32>
    %10 = vector.extract_strided_slice %4 {offsets = [0, 1], sizes = [32, 1], strides = [1, 1]} : vector<32x4xf32> to vector<32x1xf32>
    %11 = vector.extract_strided_slice %2 {offsets = [1, 0], sizes = [1, 256], strides = [1, 1]} : vector<4x256xf32> to vector<1x256xf32>
    %12 = vector.broadcast %10 : vector<32x1xf32> to vector<32x256xf32>
    %13 = vector.broadcast %11 : vector<1x256xf32> to vector<32x256xf32>
    %14 = arith.mulf %12, %13 : vector<32x256xf32>
    %15 = arith.addf %9, %14 : vector<32x256xf32>
    %16 = vector.extract_strided_slice %4 {offsets = [0, 2], sizes = [32, 1], strides = [1, 1]} : vector<32x4xf32> to vector<32x1xf32>
    %17 = vector.extract_strided_slice %2 {offsets = [2, 0], sizes = [1, 256], strides = [1, 1]} : vector<4x256xf32> to vector<1x256xf32>
    %18 = vector.broadcast %16 : vector<32x1xf32> to vector<32x256xf32>
    %19 = vector.broadcast %17 : vector<1x256xf32> to vector<32x256xf32>
    %20 = arith.mulf %18, %19 : vector<32x256xf32>
    %21 = arith.addf %15, %20 : vector<32x256xf32>
    %22 = vector.extract_strided_slice %4 {offsets = [0, 3], sizes = [32, 1], strides = [1, 1]} : vector<32x4xf32> to vector<32x1xf32>
    %23 = vector.extract_strided_slice %2 {offsets = [3, 0], sizes = [1, 256], strides = [1, 1]} : vector<4x256xf32> to vector<1x256xf32>
    %24 = vector.broadcast %22 : vector<32x1xf32> to vector<32x256xf32>
    %25 = vector.broadcast %23 : vector<1x256xf32> to vector<32x256xf32>
    %26 = arith.mulf %24, %25 : vector<32x256xf32>
    %27 = arith.addf %21, %26 : vector<32x256xf32>
    %c0_4 = arith.constant 0 : index
    %c0_5 = arith.constant 0 : index
    %28 = vector.load %arg4[%c0_4, %c0_5] : memref<32x1xf32, #tpu.memory_space<vmem>>, vector<32x1xf32>
    %29 = vector.broadcast %28 : vector<32x1xf32> to vector<32x256xf32>
    %30 = arith.addf %27, %29 : vector<32x256xf32>
    %cst = arith.constant 0.000000e+00 : f32
    %31 = vector.broadcast %cst : f32 to vector<32x256xf32>
    %32 = arith.maximumf %30, %31 : vector<32x256xf32>
    %33 = arith.truncf %32 : vector<32x256xf32> to vector<32x256xbf16>
    %c0_6 = arith.constant 0 : index
    %c0_7 = arith.constant 0 : index
    %c0_8 = arith.constant 0 : index
    %34 = vector.load %arg5[%c0_6, %c0_7, %c0_8] : memref<1x32x256xbf16, #tpu.memory_space<vmem>>, vector<1x32x256xbf16>
    %35 = vector.shape_cast %34 : vector<1x32x256xbf16> to vector<32x256xbf16>
    %36 = vector.shape_cast %33 : vector<32x256xbf16> to vector<1x32x256xbf16>
    tpu.vector_store %arg5[%c0_6, %c0_7, %c0_8], %36 {strides = array<i32>} : memref<1x32x256xbf16, #tpu.memory_space<vmem>>, vector<1x32x256xbf16>,
    return
  }
  func.func @transform_0(%arg0: i32, %arg1: i32) -> (i32, i32, i32) {
    %c0_i32 = arith.constant 0 : i32
    %c0_i32_0 = arith.constant 0 : i32
    return %arg0, %c0_i32, %arg1 : i32, i32, i32
  }
  func.func @transform_1(%arg0: i32, %arg1: i32) -> (i32, i32) {
    %c0_i32 = arith.constant 0 : i32
    %c0_i32_0 = arith.constant 0 : i32
    %c0_i32_1 = arith.constant 0 : i32
    return %c0_i32, %c0_i32_0 : i32, i32
  }
  func.func @transform_2(%arg0: i32, %arg1: i32) -> (i32, i32) {
    %c0_i32 = arith.constant 0 : i32
    %c0_i32_0 = arith.constant 0 : i32
    %c0_i32_1 = arith.constant 0 : i32
    return %c0_i32, %c0_i32_0 : i32, i32
  }
  func.func @transform_3(%arg0: i32, %arg1: i32) -> (i32, i32, i32) {
    %c0_i32 = arith.constant 0 : i32
    %c0_i32_0 = arith.constant 0 : i32
    return %arg0, %c0_i32, %arg1 : i32, i32, i32
  }
}

</mosaic_0001>

<bundles_post_ra>
// kernel: tpu_custom_call.1
= control target key start
LH: loop header
LB: loop body
LE: loop exit
PB: predicated region body
PF: predicated region fallthrough
CT: control target
= control target key end

     0   :  { %8 = vsyncpa [#allocation3], 0  ;;  %s967_s0 = inlined_call_operand.vmem [shape: bf16[2,4,256], index: 0, kind: input, shape index: {}]   ;;  %s968_s1 = inlined_call_operand.vmem [shape: bf16[32,4], index: 1, kind: input, shape index: {}]   ;;  %s969_s2 = inlined_call_operand.vmem [shape: f32[32,1], index: 2, kind: input, shape index: {}]   ;;  %s970_s3 = inlined_call_operand.hbm [shape: bf16[2,32,256], index: 3, kind: output, shape index: {}]  }
   0x1   :  { %10 = vsyncpa [#allocation3 + $0x1], 0  ;;  %s818_s12 = smov 0   ;;  %s820_s13 = smov 0  }
   0x2   :  { %s822_s14 = smov 0   ;;  %s824_s15 = smov 0  }
   0x3   :  { %s826_s16 = smov 0   ;;  %s828_s17 = smov 0  }
   0x4 LB: > { %s570_s18 = sadd.s32 4294967295, %s789_s17   ;;  %s571_s19 = sadd.s32 4294967294, %s789_s17   ;;  %s789_s17 = sphi %s828_s17, %s16_s17   ;;  %s785_s16 = sphi %s826_s16, %s977_s16   ;;  %s781_s15 = sphi %s824_s15, %s976_s15   ;;  %s777_s14 = sphi %s822_s14, %s975_s14   ;;  %s773_s13 = sphi %s820_s13, %s974_s13   ;;  %s769_s12 = sphi %s818_s12, %s973_s12  }
   0x5   : > { %s28_s20 = sadd.s32 1, %s785_s16  ;;  %s107_s21 = sadd.s32 1, %s777_s14 }
   0x6   : > { %p30_p0 = scmp.ge.s32.totalorder %s28_s20, 2  ;;  %p117_p1 = scmp.ne.s32.totalorder %s777_s14, %s773_s13 }
   0x7   : > { %p118_p2 = scmp.eq.s32.totalorder %s570_s18, 1  ;;  %p123_p3 = scmp.ne.s32.totalorder %s773_s13, %s769_s12 }
   0x8   : > { %s979_s20 = smov (%p30_p0, %s28_s20), 0  ;;  %p124_p5 = scmp.eq.s32.totalorder %s571_s19, 1 }
   0x9   : > { %p858_p4 = por %p118_p2, %p117_p1  ;;  %s102_s23 = ssub.s32 %s785_s16, %s979_s20 }
   0xa   : > { %p574_p6 = scmp.ge.s32.totalorder %s789_s17, 1  ;;  %p105_p7 = scmp.eq.s32.totalorder %s102_s23, 0 }
   0xb   : > { %p865_p8 = por %p124_p5, %p123_p3  ;;  %p161_p9 = scmp.lt.s32.totalorder %s789_s17, 3 }
   0xc   : > { %s871_s25 = scalar_select %p105_p7, %s777_s14, %s107_s21  }
   0xd   : > { %p162_p10 = pnand %p574_p6, %p161_p9 }
   0xe   : > { %v594_v0 = vld [vmem:[%s968_s1] sm:$0xff] (!%p162_p10)   ;;  %v601_v1 = vld [vmem:[%s968_s1 + $0x8] sm:$0xff] (!%p162_p10)   ;;  %v791_v2 = vmov (!%p162_p10), 1   ;;  %v792_v3 = vmov (!%p162_p10), 0   ;;  %v793_v10 = vmov (!%p162_p10), 2   ;;  %v794_v11 = vmov (!%p162_p10), 3  }
   0xf   : > { %165 = sbr.rel (%p162_p10) target bundleno = 195 (0xc3), region = 32  ;;  %674 = vset.pattern.permute.xlu1 (!%p162_p10), %v791_v2  ;;  %663 = vset.pattern.permute.xlu0 (!%p162_p10), %v792_v3  ;;  %v595_v4 = vunpack.c.l.bf16 (!%p162_p10), %v594_v0  ;;  %v596_v5 = vunpack.c.h.bf16 (!%p162_p10), %v594_v0  ;;  %v599_v6 = vunpack.c.l.bf16 (!%p162_p10), %v601_v1  ;;  %v600_v7 = vunpack.c.h.bf16 (!%p162_p10), %v601_v1  ;;  %v407_v12 = vld [vmem:[%s969_s2] sm:$0xff] (!%p162_p10)  ;;  %v409_v13 = vld [vmem:[%s969_s2 + $0x10] sm:$0xff] (!%p162_p10)  ;;  %v408_v14 = vld [vmem:[%s969_s2 + $0x8] sm:$0xff] (!%p162_p10)  ;;  %p190_p11 = scmp.lt.s32.totalorder (!%p162_p10), %s781_s15, 1 }
  0x10   : > { %v410_v15 = vld [vmem:[%s969_s2 + $0x18] sm:$0xff] (!%p162_p10)  ;;  %v231_v16 = vlaneseq (!%p162_p10)  ;;  %s186_s26 = sand.u32 (!%p162_p10), 1, %s773_s13   ;;  %s592_s30 = sshll.u32 (!%p162_p10), %s781_s15, 9 }
  0x11   : > { %v675_v8 = vpack.i.bf16 (!%p162_p10), %v596_v5, %v595_v4  ;;  %v680_v9 = vpack.i.bf16 (!%p162_p10), %v600_v7, %v599_v6  ;;  %s575_s27 = sshll.u32 (!%p162_p10), %s186_s26, 5  ;;  %s917_s6 = scalar_lea.hbm (!%p162_p10), %s970_s3, %s592_s30 }
  0x12   : > { %v232_v17 = vshrl.u32 (!%p162_p10), %v231_v16, 7  ;;  %s188_s28 = scalar_lea.vmem (!%p162_p10), [#allocation2], %s575_s27  ;;  %s921_s7 = scalar_lea.sflag (!%p162_p10), [#allocation3], %s186_s26 }
  0x13   : > { %676 = vperm.xlu1 (!%p162_p10), %674, %v675_v8   ;;  %665 = vperm.xlu0 (!%p162_p10), %663, %v675_v8   ;;  %s491_s29 = sshll.u32 (!%p162_p10), %s188_s28, 4  ;;  %s912_s29 = int_to_ptr.vmem [resolvable:$true] %s491_s29 }
  0x14   : > { %v275_v19 = vsub.s32 (!%p162_p10), 1, %v232_v17  ;;  %v279_v21 = vsub.s32 (!%p162_p10), 5, %v232_v17  ;;  %v233_v22 = vsub.s32 (!%p162_p10), 0, %v232_v17  ;;  %v237_v23 = vsub.s32 (!%p162_p10), 4, %v232_v17  ;;  %s711_s8 = scalar_lea.vmem (!%p162_p10), %s912_s29, 512 }
  0x15   : > { %v325_v24 = vsub.s32 (!%p162_p10), 2, %v232_v17  ;;  %v329_v25 = vsub.s32 (!%p162_p10), 6, %v232_v17  ;;  %v375_v37 = vsub.s32 (!%p162_p10), 3, %v232_v17  ;;  %v379_v38 = vsub.s32 (!%p162_p10), 7, %v232_v17  ;;  %p712_p12 = scmp.ne.s32.totalorder (!%p162_p10), %s912_s29, %s711_s8 }
  0x16   : > { %s191_s11 = scalar_select %p190_p11, %s781_s15, 1 }
  0x17   : > { %681 = vperm.xlu1 %674, %v680_v9   ;;  %670 = vperm.xlu0 %663, %v680_v9   ;;  %p713_p13 = pnand %p712_p12, %p858_p4  ;;  %s795_s15 = smov [#allocation2]  }
  0x18   : > { %s587_s18 = sshll.u32 %s191_s11, 2  ;;  %s715_s9 = sshll.u32 %s795_s15, 4  ;;  %s716_s9 = int_to_ptr.vmem [resolvable:$false] %s715_s9 }
  0x19   : > { %s197_s23 = scalar_lea.vmem %s967_s0, %s587_s18  ;;  %p714_p0 = pneg %p713_p13 }
  0x1a   : > { %v200_v18 = vld [vmem:[%s197_s23] sm:$0xf]  ;;  %s717_s10 = scalar_lea.vmem %s716_s9, 1024  ;;  %p718_p1 = scmp.lt.s32.totalorder %s912_s29, %s716_s9 }
  0x1b   : > { %691 = vset.pattern.permute.xlu1 %v793_v10  ;;  %685 = vset.pattern.permute.xlu0 %v793_v10  ;;  %v201_v20 = vunpack.c.l.bf16 %v200_v18  ;;  %p719_p2 = scmp.lt.s32.totalorder %s717_s10, %s711_s8 }
  0x1c   : > { %693 = vperm.xlu1 %691, %v680_v9   ;;  %687 = vperm.xlu0 %685, %v675_v8  }
  0x1d   : > { %v276_v26 = vrot.slane %v201_v20, %v275_v19  ;;  %v280_v27 = vrot.slane %v201_v20, %v279_v21  ;;  %v234_v28 = vrot.slane %v201_v20, %v233_v22  ;;  %v238_v29 = vrot.slane %v201_v20, %v237_v23  ;;  %p720_p3 = por %p719_p2, %p718_p1 }
  0x1e   : > { %v326_v32 = vrot.slane %v201_v20, %v325_v24  ;;  %v330_v33 = vrot.slane %v201_v20, %v329_v25  ;;  %v376_v54 = vrot.slane %v201_v20, %v375_v37  ;;  %v380_v55 = vrot.slane %v201_v20, %v379_v38 }
  0x1f   : > { %v286_v34 = vrot.slane %v276_v26, %v275_v19  ;;  %v290_v36 = vrot.slane %v280_v27, %v275_v19  ;;  %v244_v41 = vrot.slane %v234_v28, %v233_v22  ;;  %v248_v42 = vrot.slane %v238_v29, %v233_v22  ;;  %p721_p5 = pnand %p720_p3, %p714_p0 }
  0x20   : > { %697 = vset.pattern.permute.xlu1 %v794_v11  ;;  %703 = vset.pattern.permute.xlu0 %v794_v11  ;;  %v896_v46 = vrot.slane %v326_v32, %v325_v24  ;;  %v898_v47 = vrot.slane %v330_v33, %v325_v24 }
  0x21   : > { %699 = vperm.xlu1 %697, %v675_v8   ;;  %705 = vperm.xlu0 %703, %v680_v9   ;;  %v386_v8 = vrot.slane %v376_v54, %v375_v37  ;;  %v390_v9 = vrot.slane %v380_v55, %v375_v37 }
  0x25   : > { %709 = vset.pattern.permute.xlu1 %v792_v3  ;;  %710 = vset.pattern.permute.xlu0 %v792_v3 }
  0x26   : > { %413 = vperm.xlu1 %709, %v407_v12   ;;  %423 = vperm.xlu0 %710, %v409_v13  }
  0x2a   : > { %418 = vperm.xlu1 %709, %v408_v14  }
  0x2e   : > { %428 = vperm.xlu1 %709, %v410_v15  }
  0x92   : > { %v677_v30 = vpop.permute.xlu1 %676  ;;  %v666_v31 = vpop.permute.xlu0 %665 }
  0x93   : > { %v678_v35 = vunpack.i.l.bf16 %v677_v30  ;;  %v679_v39 = vunpack.i.h.bf16 %v677_v30  ;;  %v667_v40 = vunpack.i.l.bf16 %v666_v31  ;;  %v668_v43 = vunpack.i.h.bf16 %v666_v31 }
  0x95   : > { %v291_v52 = vmul.f32 %v678_v35, %v286_v34  ;;  %v292_v53 = vmul.f32 %v678_v35, %v290_v36  ;;  %v293_v56 = vmul.f32 %v679_v39, %v286_v34  ;;  %v294_v57 = vmul.f32 %v679_v39, %v290_v36 }
  0x96   : > { %v682_v44 = vpop.permute.xlu1 %681  ;;  %v671_v45 = vpop.permute.xlu0 %670  ;;  %v249_v58 = vmul.f32 %v667_v40, %v244_v41  ;;  %v250_v59 = vmul.f32 %v667_v40, %v248_v42  ;;  %v251_v60 = vmul.f32 %v668_v43, %v244_v41  ;;  %v252_v61 = vmul.f32 %v668_v43, %v248_v42 }
  0x97   : > { %v684_v48 = vunpack.i.h.bf16 %v682_v44  ;;  %v683_v49 = vunpack.i.l.bf16 %v682_v44  ;;  %v673_v50 = vunpack.i.h.bf16 %v671_v45  ;;  %v672_v51 = vunpack.i.l.bf16 %v671_v45 }
  0x98   : > { %v299_v10 = vadd.f32 %v291_v52, %v249_v58  ;;  %v300_v14 = vadd.f32 %v292_v53, %v250_v59  ;;  %v301_v15 = vadd.f32 %v293_v56, %v251_v60  ;;  %v302_v16 = vadd.f32 %v294_v57, %v252_v61 }
  0x99   : > { %v295_v62 = vmul.f32 %v683_v49, %v286_v34  ;;  %v253_v63 = vmul.f32 %v672_v51, %v244_v41  ;;  %v296_v0 = vmul.f32 %v683_v49, %v290_v36  ;;  %v297_v1 = vmul.f32 %v684_v48, %v286_v34 }
  0x9a   : > { %v254_v2 = vmul.f32 %v672_v51, %v248_v42  ;;  %v255_v3 = vmul.f32 %v673_v50, %v244_v41  ;;  %v298_v6 = vmul.f32 %v684_v48, %v290_v36  ;;  %v256_v7 = vmul.f32 %v673_v50, %v248_v42 }
  0x9b   : > { %v694_v4 = vpop.permute.xlu1 %693  ;;  %v688_v5 = vpop.permute.xlu0 %687  ;;  %v303_v17 = vadd.f32 %v295_v62, %v253_v63 }
  0x9c   : > { %v695_v11 = vunpack.i.l.bf16 %v694_v4  ;;  %v690_v12 = vunpack.i.h.bf16 %v688_v5  ;;  %v689_v13 = vunpack.i.l.bf16 %v688_v5  ;;  %v304_v18 = vadd.f32 %v296_v0, %v254_v2 }
  0x9d   : > { %v305_v19 = vadd.f32 %v297_v1, %v255_v3  ;;  %v306_v22 = vadd.f32 %v298_v6, %v256_v7  ;;  %v696_v23 = vunpack.i.h.bf16 %v694_v4 }
  0x9e   : > { %v345_v20 = vmul.f32 %v695_v11, %v896_v46  ;;  %v346_v21 = vmul.f32 %v695_v11, %v898_v47  ;;  %v341_v24 = vmul.f32 %v689_v13, %v896_v46  ;;  %v342_v25 = vmul.f32 %v689_v13, %v898_v47 }
  0x9f   : > { %v343_v28 = vmul.f32 %v690_v12, %v896_v46  ;;  %v344_v32 = vmul.f32 %v690_v12, %v898_v47  ;;  %v347_v44 = vmul.f32 %v696_v23, %v896_v46  ;;  %v348_v45 = vmul.f32 %v696_v23, %v898_v47 }
  0xa0   : > { %v700_v26 = vpop.permute.xlu1 %699  ;;  %v706_v27 = vpop.permute.xlu0 %705  ;;  %v349_v34 = vadd.f32 %v341_v24, %v299_v10  ;;  %v350_v35 = vadd.f32 %v342_v25, %v300_v14  ;;  %v353_v38 = vadd.f32 %v345_v20, %v303_v17  ;;  %v354_v39 = vadd.f32 %v346_v21, %v304_v18 }
  0xa1   : > { %v702_v29 = vunpack.i.h.bf16 %v700_v26  ;;  %v701_v30 = vunpack.i.l.bf16 %v700_v26  ;;  %v707_v31 = vunpack.i.l.bf16 %v706_v27  ;;  %v708_v33 = vunpack.i.h.bf16 %v706_v27 }
  0xa2   : > { %v351_v54 = vadd.f32 %v343_v28, %v301_v15  ;;  %v352_v55 = vadd.f32 %v344_v32, %v302_v16  ;;  %v355_v1 = vadd.f32 %v347_v44, %v305_v19  ;;  %v356_v2 = vadd.f32 %v348_v45, %v306_v22 }
  0xa3   : > { %v391_v36 = vmul.f32 %v701_v30, %v386_v8  ;;  %v392_v37 = vmul.f32 %v701_v30, %v390_v9  ;;  %v393_v40 = vmul.f32 %v702_v29, %v386_v8  ;;  %v394_v41 = vmul.f32 %v702_v29, %v390_v9 }
  0xa4   : > { %v395_v42 = vmul.f32 %v707_v31, %v386_v8  ;;  %v396_v43 = vmul.f32 %v707_v31, %v390_v9  ;;  %v397_v56 = vmul.f32 %v708_v33, %v386_v8  ;;  %v398_v57 = vmul.f32 %v708_v33, %v390_v9 }
  0xa5   : > { %v414_v48 = vpop.permute.xlu1 %413  ;;  %v399_v49 = vadd.f32 %v391_v36, %v349_v34  ;;  %v400_v50 = vadd.f32 %v392_v37, %v350_v35  ;;  %v424_v51 = vpop.permute.xlu0 %423  ;;  %v401_v62 = vadd.f32 %v393_v40, %v351_v54  ;;  %v402_v46 = vadd.f32 %v394_v41, %v352_v55 }
  0xa6   : > { %v403_v52 = vadd.f32 %v395_v42, %v353_v38  ;;  %v404_v53 = vadd.f32 %v396_v43, %v354_v39  ;;  %v405_v8 = vadd.f32 %v397_v56, %v355_v1  ;;  %v406_v12 = vadd.f32 %v398_v57, %v356_v2 }
  0xa7   : > { %v431_v58 = vadd.f32 %v414_v48, %v399_v49  ;;  %v432_v59 = vadd.f32 %v414_v48, %v400_v50 }
  0xa8   : > { %v435_v60 = vadd.f32 %v424_v51, %v403_v52  ;;  %v436_v61 = vadd.f32 %v424_v51, %v404_v53 }
  0xa9   : > { %v439_v63 = vmax.f32 %v431_v58, 0.0  ;;  %v440_v47 = vmax.f32 %v432_v59, 0.0  ;;  %v419_v0 = vpop.permute.xlu1 %418 }
  0xaa   : > { %v443_v3 = vmax.f32 %v435_v60, 0.0  ;;  %v444_v4 = vmax.f32 %v436_v61, 0.0  ;;  %v433_v5 = vadd.f32 %v419_v0, %v401_v62  ;;  %v434_v6 = vadd.f32 %v419_v0, %v402_v46 }
  0xab   : > { %v588_v7 = vpack.c.bf16 %v440_v47, %v439_v63 }
  0xac   : > { %v590_v9 = vpack.c.bf16 %v444_v4, %v443_v3  ;;  %v441_v10 = vmax.f32 %v433_v5, 0.0  ;;  %v442_v11 = vmax.f32 %v434_v6, 0.0 }
  0xad   : > { %471 = vst [vmem:[%s188_s28] sm:$0xff] %v588_v7  ;;  %v429_v13 = vpop.permute.xlu1 %428 }
  0xae   : > { %473 = vst [vmem:[%s188_s28 + $0x10] sm:$0xff] %v590_v9  ;;  %v589_v14 = vpack.c.bf16 %v442_v11, %v441_v10  ;;  %v437_v15 = vadd.f32 %v429_v13, %v405_v8  ;;  %v438_v16 = vadd.f32 %v429_v13, %v406_v12 }
  0xb0   : > { %472 = vst [vmem:[%s188_s28 + $0x8] sm:$0xff] %v589_v14  ;;  %v445_v17 = vmax.f32 %v437_v15, 0.0  ;;  %v446_v18 = vmax.f32 %v438_v16, 0.0 }
  0xb2   : > { %v591_v19 = vpack.c.bf16 %v446_v18, %v445_v17 }
  0xb4   : > { %474 = vst [vmem:[%s188_s28 + $0x18] sm:$0xff] %v591_v19 }
  0xb5   : > { %724 = shalt.err (!%p721_p5)
}
  0xb6   : > { %s725_s11 = scalar_lea.hbm %s917_s6, 512  ;;  %s729_s21 = scalar_lea.hbm %s970_s3, 1024 }
  0xb7   : > { %p726_p6 = scmp.ne.s32.totalorder %s917_s6, %s725_s11  ;;  %p730_p10 = scmp.lt.u32.totalorder %s917_s6, %s970_s3 }
  0xb8   : > { %p731_p11 = scmp.lt.u32.totalorder %s729_s21, %s725_s11  ;;  %p733_p13 = scmp.lt.u32.totalorder %s725_s11, %s917_s6 }
  0xb9   : > { %p727_p7 = pnand %p726_p6, %p858_p4 }
  0xba   : > { %p732_p12 = por %p731_p11, %p730_p10 }
  0xbb   : > { %p728_p9 = pneg %p727_p7 }
  0xbc   : > { %p734_p0 = por %p733_p13, %p732_p12 }
  0xbe   : > { %p735_p1 = pnand %p734_p0, %p728_p9 }
  0xc0   : > { %738 = shalt.err (!%p735_p1)
}
  0xc1   : > { %s796_s27 = smov 128   ;;  %s797_s28 = smov 8  }
  0xc2   : > { %602 = dma.vmem_to_hbm [thread:$0]  (%p858_p4), %s912_s29, 512, %s917_s6, %s921_s7, %s796_s27, %s796_s27, %s797_s28  }
  0xc3 PF: > { %p608_p2 = scmp.ge.s32.totalorder %s789_s17, 2  ;;  %s506_s30 = sand.u32 1, %s769_s12  }
  0xc4   : > { %s507_s4 = scalar_lea.sflag [#allocation3], %s506_s30 }
  0xc5   : > { %p605_p3 = pnand %p608_p2, %p865_p8 }
  0xc7   : > { %764 = dma.done.wait (!%p605_p3), %s507_s4, 512  }
  0xc8   : > { %766 = vsyncadd (!%p605_p3), %s507_s4, 4294966784  ;;  %s16_s17 = sadd.s32 1, %s789_s17   ;;  %s973_s12 = smov %s773_s13 }
  0xc9   : > { %p13_p5 = scmp.ge.s32.totalorder %s16_s17, 4   ;;  %s974_s13 = smov %s777_s14 }
  0xca   : > { %s975_s14 = smov %s871_s25  ;;  %s976_s15 = smov %s785_s16 }
  0xcb   : > { %s977_s16 = smov %s979_s20  ;;  %15 = sbr.rel (!%p13_p5) target bundleno = 4 (0x4), region = 67 }
  0xd2   :  { %512 = vsyncpa [#allocation3], 1 }
  0xd3   :  { %514 = vsyncpa [#allocation3 + $0x1], 1 }

</bundles_post_ra>
